<compile_context>
chip_gen: v5e
topology: v5e:2x2
jax: 0.10.0
libtpu: 0.0.40
codegen_flags: <defaults>
</compile_context>

<pallas_src>
import numpy as np
import jax
import jax.numpy as jnp
from jax.experimental import pallas as pl
from jax.experimental.pallas import tpu as pltpu

K = 3        # Conv2d kernel size
STRIDE = 2   # Conv2d stride
_MIB = 1024 * 1024


def _conv_mm_kernel(p_ref, w_ref, b_ref, o_ref):
    # p_ref: (1, 9, TP)     im2col patch tile (contraction dim on sublanes, P on lanes)
    # w_ref: (odim, 9)      flattened conv weight (constant index_map -> resident)
    # b_ref: (odim, 1)      bias column (broadcast over lanes)
    # o_ref: (1, odim, TP)  flattened-NCHW output tile (lane-dense, unmasked stores)
    acc = jnp.dot(w_ref[...], p_ref[0], preferred_element_type=jnp.float32)  # (odim, TP)
    acc = acc + b_ref[...]
    o_ref[0] = jnp.maximum(acc, 0.0).astype(o_ref.dtype)                      # ReLU


def _vmem_capacity_bytes():
    try:
        return int(pltpu.get_tpu_info().vmem_capacity_bytes)
    except Exception:
        return 64 * _MIB   # conservative (v7x-sized) fallback


def _pick_p_tile(P, odim, B, vmem_bytes):
    """Largest lane tile (multiple of 128, or the full P extent) whose double-buffered
    patch + output tiles plus the f32 dot temporary fit a generation-aware budget."""
    # 128-MiB-VMEM parts (v5e/v6e) get a 24 MiB working set, v7x (64 MiB) gets 20 MiB,
    # leaving ample headroom under the explicit vmem_limit_bytes passed to the call.
    budget = 24 * _MIB if vmem_bytes >= 128 * _MIB else 20 * _MIB
    kk_pad = ((K * K + 7) // 8) * 8                    # 9 -> 16 sublane padding (f32)
    bytes_per_col = 4 * (2 * kk_pad + 3 * odim)        # 2x patch bufs + 2x out bufs + dot temp
    tp = (budget // bytes_per_col) // 128 * 128
    tp = int(max(128, tp))
    if P <= tp:
        tp = P                                         # block == full dim is always legal

    # Best effort: give both v7x TensorCores at least 2 pipeline steps each.
    min_steps = 4
    n_p = -(-P // tp)
    if B * n_p < min_steps:
        n_target = -(-min_steps // B)
        if P >= n_target * 128:
            tp = int(max(128, (P // n_target) // 128 * 128))
    return tp


def conv2d_subsampling_forward(x, weight, bias):
    """x: (B, T, idim) f32; weight: (odim, 1, 3, 3); bias: (odim,).

    Returns (B, odim, Ho, Wo), identical to
    ReLU(Conv2d(1, odim, 3, stride=2)(x.unsqueeze(1))) in PyTorch.
    """
    B, T, F = x.shape
    odim = weight.shape[0]
    Ho = (T - K) // STRIDE + 1
    Wo = (F - K) // STRIDE + 1
    P = Ho * Wo

    # --- glue: lane-dense im2col (B, 9, P); strided views stacked once in HBM ---
    # TODO(synk): fusing im2col into the kernel (raw x row-windows + in-kernel
    # stride-2 gather) would save ~4.5x-input-bytes of HBM traffic, but it needs
    # overlapping input windows and conflicts with the lane-dense (P-on-lanes)
    # output layout that dominates the traffic; left out to keep lowering risk at
    # zero (costs ~7-10% of HBM bytes at odim=256, more for small odim).
    cols = []
    for kh in range(K):
        for kw in range(K):
            cols.append(
                x[:, kh:kh + STRIDE * (Ho - 1) + 1:STRIDE,
                      kw:kw + STRIDE * (Wo - 1) + 1:STRIDE])        # (B, Ho, Wo)
    patches = jnp.stack(cols, axis=1).reshape(B, K * K, P)           # (B, 9, P)

    # weight (odim, 1, 3, 3) -> (odim, 9); row order kh*3+kw matches the patch stacking
    w_mat = weight[:, 0].reshape(odim, K * K)
    b_col = bias.reshape(odim, 1)

    vmem_bytes = _vmem_capacity_bytes()
    TP = _pick_p_tile(P, odim, B, vmem_bytes)
    n_p = pl.cdiv(P, TP)
    vmem_limit = 64 * _MIB if vmem_bytes >= 128 * _MIB else 32 * _MIB

    out = pl.pallas_call(
        _conv_mm_kernel,
        out_shape=jax.ShapeDtypeStruct((B, odim, P), x.dtype),
        grid_spec=pltpu.PrefetchScalarGridSpec(
            num_scalar_prefetch=0,
            grid=(B, n_p),
            in_specs=[
                pl.BlockSpec((1, K * K, TP), lambda b, t: (b, 0, t)),
                pl.BlockSpec((odim, K * K), lambda b, t: (0, 0)),
                pl.BlockSpec((odim, 1), lambda b, t: (0, 0)),
            ],
            out_specs=pl.BlockSpec((1, odim, TP), lambda b, t: (b, 0, t)),
        ),
        compiler_params=pltpu.CompilerParams(
            dimension_semantics=("parallel", "parallel"),
            vmem_limit_bytes=vmem_limit),
    )(patches, w_mat, b_col)

    # contiguous reshape only (already channel-major): no HBM transpose / slice pass
    return out.reshape(B, odim, Ho, Wo)


# TODO(synk): self.out (Linear + PositionalEncoding + Dropout) is never invoked in
# the reference forward(), so it is intentionally not implemented here.


if __name__ == "__main__":
    key = jax.random.PRNGKey(0)
    kx, kw_, kb = jax.random.split(key, 3)

    B, T, idim, odim = 2, 16, 16, 32
    x = jax.random.normal(kx, (B, T, idim), dtype=jnp.float32)

    # deterministic parameter init (shapes match torch.nn.Conv2d(1, odim, 3, 2))
    fan_in = 1 * K * K
    bound = 1.0 / np.sqrt(fan_in)
    weight = jax.random.uniform(kw_, (odim, 1, K, K), jnp.float32, -bound, bound)
    bias = jax.random.uniform(kb, (odim,), jnp.float32, -bound, bound)

    y = conv2d_subsampling_forward(x, weight, bias)
    y = jax.block_until_ready(y)

    # sanity check against XLA's conv (same semantics as the PyTorch module)
    ref = jax.lax.conv_general_dilated(
        x[:, None, :, :], weight, window_strides=(STRIDE, STRIDE),
        padding="VALID", dimension_numbers=("NCHW", "OIHW", "NCHW"))
    ref = jnp.maximum(ref + bias[None, :, None, None], 0.0)
    np.testing.assert_allclose(np.asarray(y), np.asarray(ref), rtol=1e-5, atol=1e-5)

    print("KERNEL_OK")
</pallas_src>

<mosaic_0001>
module attributes {stable_mosaic.version = 11 : i64} {
  func.func @_conv_mm_kernel(%arg0: i32, %arg1: i32, %arg2: memref<1x9x49xf32, #tpu.memory_space<vmem>>, %arg3: memref<32x9xf32, #tpu.memory_space<vmem>>, %arg4: memref<32x1xf32, #tpu.memory_space<vmem>>, %arg5: memref<1x32x49xf32, #tpu.memory_space<vmem>>) attributes {dimension_semantics = [#tpu.dimension_semantics<parallel>, #tpu.dimension_semantics<parallel>], iteration_bounds = array<i64: 2, 1>, scalar_prefetch = 0 : i64, scratch_operands = 0 : i64, tpu.core_type = #tpu.core_type<tc>, window_params = [{transform_indices = @transform_0, window_bounds = array<i64: 1, 9, 49>}, {pipeline_mode = #tpu.pipeline_mode<synchronous>, transform_indices = @transform_1, window_bounds = array<i64: 32, 9>}, {pipeline_mode = #tpu.pipeline_mode<synchronous>, transform_indices = @transform_2, window_bounds = array<i64: 32, 1>}, {transform_indices = @transform_3, window_bounds = array<i64: 1, 32, 49>}]} {
    %c0 = arith.constant 0 : index
    %c0_0 = arith.constant 0 : index
    %0 = vector.load %arg3[%c0, %c0_0] : memref<32x9xf32, #tpu.memory_space<vmem>>, vector<32x9xf32>
    %c0_1 = arith.constant 0 : index
    %c0_2 = arith.constant 0 : index
    %c0_3 = arith.constant 0 : index
    %1 = vector.load %arg2[%c0_1, %c0_2, %c0_3] : memref<1x9x49xf32, #tpu.memory_space<vmem>>, vector<1x9x49xf32>
    %2 = vector.shape_cast %1 : vector<1x9x49xf32> to vector<9x49xf32>
    %cst = arith.constant dense<0.000000e+00> : vector<32x49xf32>
    %3 = tpu.matmul %0, %2, %cst {dimension_numbers = #tpu.dot_dimension_numbers<[1], [0], [0], [1], [0, 0, 1, 1], [], []>} : vector<32x9xf32>, vector<9x49xf32>, vector<32x49xf32> -> vector<32x49xf32>
    %c0_4 = arith.constant 0 : index
    %c0_5 = arith.constant 0 : index
    %4 = vector.load %arg4[%c0_4, %c0_5] : memref<32x1xf32, #tpu.memory_space<vmem>>, vector<32x1xf32>
    %5 = vector.broadcast %4 : vector<32x1xf32> to vector<32x49xf32>
    %6 = arith.addf %3, %5 : vector<32x49xf32>
    %cst_6 = arith.constant 0.000000e+00 : f32
    %7 = vector.broadcast %cst_6 : f32 to vector<32x49xf32>
    %8 = arith.maximumf %6, %7 : vector<32x49xf32>
    %c0_7 = arith.constant 0 : index
    %c0_8 = arith.constant 0 : index
    %c0_9 = arith.constant 0 : index
    %9 = vector.load %arg5[%c0_7, %c0_8, %c0_9] : memref<1x32x49xf32, #tpu.memory_space<vmem>>, vector<1x32x49xf32>
    %10 = vector.shape_cast %9 : vector<1x32x49xf32> to vector<32x49xf32>
    %11 = vector.shape_cast %8 : vector<32x49xf32> to vector<1x32x49xf32>
    tpu.vector_store %arg5[%c0_7, %c0_8, %c0_9], %11 {strides = array<i32>} : memref<1x32x49xf32, #tpu.memory_space<vmem>>, vector<1x32x49xf32>,
    return
  }
  func.func @transform_0(%arg0: i32, %arg1: i32) -> (i32, i32, i32) {
    %c0_i32 = arith.constant 0 : i32
    %c0_i32_0 = arith.constant 0 : i32
    return %arg0, %c0_i32, %arg1 : i32, i32, i32
  }
  func.func @transform_1(%arg0: i32, %arg1: i32) -> (i32, i32) {
    %c0_i32 = arith.constant 0 : i32
    %c0_i32_0 = arith.constant 0 : i32
    %c0_i32_1 = arith.constant 0 : i32
    return %c0_i32, %c0_i32_0 : i32, i32
  }
  func.func @transform_2(%arg0: i32, %arg1: i32) -> (i32, i32) {
    %c0_i32 = arith.constant 0 : i32
    %c0_i32_0 = arith.constant 0 : i32
    %c0_i32_1 = arith.constant 0 : i32
    return %c0_i32, %c0_i32_0 : i32, i32
  }
  func.func @transform_3(%arg0: i32, %arg1: i32) -> (i32, i32, i32) {
    %c0_i32 = arith.constant 0 : i32
    %c0_i32_0 = arith.constant 0 : i32
    return %arg0, %c0_i32, %arg1 : i32, i32, i32
  }
}

</mosaic_0001>

<bundles_post_ra>
// kernel: tpu_custom_call.1
= control target key start
LH: loop header
LB: loop body
LE: loop exit
PB: predicated region body
PF: predicated region fallthrough
CT: control target
= control target key end

     0   :  { %8 = vsyncpa [#allocation3], 0  ;;  %s688_s0 = inlined_call_operand.vmem [shape: f32[2,9,49], index: 0, kind: input, shape index: {}]   ;;  %s689_s1 = inlined_call_operand.vmem [shape: f32[32,9], index: 1, kind: input, shape index: {}]   ;;  %s690_s2 = inlined_call_operand.vmem [shape: f32[32,1], index: 2, kind: input, shape index: {}]   ;;  %s691_s3 = inlined_call_operand.hbm [shape: f32[2,32,49], index: 3, kind: output, shape index: {}]  }
   0x1   :  { %10 = vsyncpa [#allocation3 + $0x1], 0  ;;  %s563_s12 = smov 0   ;;  %s565_s13 = smov 0  }
   0x2   :  { %s567_s14 = smov 0   ;;  %s569_s15 = smov 0  }
   0x3   :  { %s571_s16 = smov 0   ;;  %s573_s17 = smov 0  }
   0x4 LB: > { %s374_s18 = sadd.s32 4294967295, %s538_s17   ;;  %s375_s19 = sadd.s32 4294967294, %s538_s17   ;;  %s538_s17 = sphi %s573_s17, %s16_s17   ;;  %s534_s16 = sphi %s571_s16, %s698_s16   ;;  %s530_s15 = sphi %s569_s15, %s697_s15   ;;  %s526_s14 = sphi %s567_s14, %s696_s14   ;;  %s522_s13 = sphi %s565_s13, %s695_s13   ;;  %s518_s12 = sphi %s563_s12, %s694_s12  }
   0x5   : > { %s28_s20 = sadd.s32 1, %s534_s16  ;;  %s107_s21 = sadd.s32 1, %s526_s14 }
   0x6   : > { %p30_p0 = scmp.ge.s32.totalorder %s28_s20, 2  ;;  %p117_p1 = scmp.ne.s32.totalorder %s526_s14, %s522_s13 }
   0x7   : > { %p118_p2 = scmp.eq.s32.totalorder %s374_s18, 1  ;;  %p123_p3 = scmp.ne.s32.totalorder %s522_s13, %s518_s12 }
   0x8   : > { %s700_s20 = smov (%p30_p0, %s28_s20), 0  ;;  %p124_p5 = scmp.eq.s32.totalorder %s375_s19, 1 }
   0x9   : > { %p603_p4 = por %p118_p2, %p117_p1  ;;  %s102_s23 = ssub.s32 %s534_s16, %s700_s20 }
   0xa   : > { %p378_p6 = scmp.ge.s32.totalorder %s538_s17, 1  ;;  %p105_p7 = scmp.eq.s32.totalorder %s102_s23, 0 }
   0xb   : > { %p610_p8 = por %p124_p5, %p123_p3  ;;  %p159_p9 = scmp.lt.s32.totalorder %s538_s17, 3 }
   0xc   : > { %s616_s25 = scalar_select %p105_p7, %s526_s14, %s107_s21  }
   0xd   : > { %p160_p10 = pnand %p378_p6, %p159_p9 }
   0xe   : > { %p186_p11 = scmp.lt.s32.totalorder (!%p160_p10), %s530_s15, 1  ;;  %s183_s30 = sand.u32 (!%p160_p10), 1, %s522_s13  }
   0xf   : > { %163 = sbr.rel (%p160_p10) target bundleno = 171 (0xab), region = 32  ;;  %s393_s5 = sshll.u32 (!%p160_p10), %s530_s15, 5 }
  0x10   : > { %s292_s8 = scalar_lea.hbm (!%p160_p10), %s691_s3, %s393_s5  ;;  %s480_s26 = scalar_lea.hbm (!%p160_p10), %s691_s3, 64 }
  0x11   : > { %s295_s11 = sshll.u32 (!%p160_p10), %s292_s8, 4  ;;  %s296_s11 = int_to_ptr.hbm [resolvable:$true] %s295_s11 }
  0x12   : > { %s474_s18 = sshra.s32 (!%p160_p10), %s296_s11, 4  ;;  %s475_s18 = int_to_ptr.hbm [resolvable:$true] %s474_s18 }
  0x13   : > { %s476_s19 = scalar_lea.hbm (!%p160_p10), %s475_s18, 32  ;;  %p481_p1 = scmp.lt.s32.totalorder (!%p160_p10), %s475_s18, %s691_s3 }
  0x14   : > { %v540_v0 = vmov 0   ;;  %v202_v1 = vld [vmem:[%s690_s2 + $0x10] sm:$0xff]  ;;  %s187_s28 = scalar_select %p186_p11, %s530_s15, 1  ;;  %v200_v2 = vld [vmem:[%s690_s2] sm:$0xff]  ;;  %vm237_vm0 = vcmask 1040384   ;;  %vm224_vm1 = vcmask 72704  }
  0x15   : > { %459 = vset.pattern.permute.xlu1 %v540_v0  ;;  %458 = vset.pattern.permute.xlu0 %v540_v0  ;;  %v194_v5 = vld [vmem:[%s689_s1] sm:$0xff]  ;;  %v195_v6 = vld [vmem:[%s689_s1 + $0x8] sm:$0xff]  ;;  %v196_v7 = vld [vmem:[%s689_s1 + $0x10] sm:$0xff]  ;;  %vm274_vm2 = vcmask 400384   ;;  %s280_s15 = scalar_lea.sflag [#allocation3], %s183_s30  ;;  %p477_p12 = scmp.ne.s32.totalorder %s475_s18, %s476_s19 }
  0x16   : > { %216 = vperm.xlu1 %459, %v202_v1   ;;  %206 = vperm.xlu0 %458, %v200_v2   ;;  %s392_s4 = sshll.u32 %s187_s28, 4  ;;  %v197_v8 = vld [vmem:[%s689_s1 + $0x18] sm:$0xff]  ;;  %v201_v10 = vld [vmem:[%s690_s2 + $0x8] sm:$0xff]  ;;  %p482_p2 = scmp.lt.s32.totalorder %s480_s26, %s476_s19 }
  0x17   : > { %s193_s7 = scalar_lea.vmem %s688_s0, %s392_s4  ;;  %v203_v9 = vld [vmem:[%s690_s2 + $0x18] sm:$0xff]  ;;  %s379_s4 = sshll.u32 %s183_s30, 5 }
  0x18   : > { %v199_v3 = vld [vmem:[%s193_s7 + $0x8] sm:$0x1]  ;;  %v198_v4 = vld [vmem:[%s193_s7] sm:$0xff]  ;;  %s185_s9 = scalar_lea.vmem [#allocation2], %s379_s4  ;;  %p478_p13 = pnand %p477_p12, %p603_p4 }
  0x19   : > { %382 = vmatpush.msk.msra.mxu0 %vm237_vm0, %v199_v3  ;;  %394 = vmatpush.msk.msra.mxu1 %vm237_vm0, %v199_v3  ;;  %s293_s10 = sshll.u32 %s185_s9, 4  ;;  %p483_p3 = por %p482_p2, %p481_p1  ;;  %s294_s10 = int_to_ptr.vmem [resolvable:$true] %s293_s10 }
  0x1a   : > { %395 = vmatpush.msk.msra.mxu2 %vm237_vm0, %v199_v3  ;;  %396 = vmatpush.msk.msra.mxu3 %vm237_vm0, %v199_v3  ;;  %p479_p0 = pneg %p478_p13 }
  0x1b   : > { %256 = vmatpush.msra.mxu0 %v198_v4  ;;  %397 = vmatpush.msra.mxu1 %v198_v4 }
  0x1c   : > { %398 = vmatpush.msra.mxu2 %v198_v4  ;;  %399 = vmatpush.msra.mxu3 %v198_v4  ;;  %p484_p5 = pnand %p483_p3, %p479_p0 }
  0x1d   : > { %383 = vmatmul.msk.f32.vlgmr.msra.gmra.mxu0 %vm224_vm1, %v194_v5  ;;  %384 = vmatmul.msk.f32.vlgmr.msra.gmra.mxu1 %vm224_vm1, %v195_v6 }
  0x1e   : > { %385 = vmatmul.msk.f32.vlgmr.msra.gmra.mxu2 %vm224_vm1, %v196_v7  ;;  %386 = vmatmul.msk.f32.vlgmr.msra.gmra.mxu3 %vm224_vm1, %v197_v8 }
  0x1f   : > { %221 = vperm.xlu1 %459, %v203_v9   ;;  %211 = vperm.xlu0 %458, %v201_v10  }
  0x88   : > { %v207_v11 = vpop.permute.xlu0 %206  ;;  %v217_v12 = vpop.permute.xlu1 %216 }
  0x91   : > { %v212_v13 = vpop.permute.xlu0 %211  ;;  %v222_v20 = vpop.permute.xlu1 %221 }
  0x9a   : > { %v258_v14 = vpop.f32.mrf.mxu0  ;;  %v261_v15 = vpop.f32.mrf.mxu1 }
  0x9b   : > { %v259_v16 = vadd.f32 %v258_v14, %v207_v11  ;;  %v262_v17 = vadd.f32 %v261_v15, %v212_v13 }
  0x9d   : > { %v270_v18 = vmax.f32 %v259_v16, 0.0  ;;  %v271_v19 = vmax.f32 %v262_v17, 0.0 }
  0x9f   : > { %275 = vst.msk [vmem:[%s185_s9] sm:$0xff] %vm274_vm2, %v270_v18 }
  0xa0   : > { %276 = vst.msk [vmem:[%s185_s9 + $0x8] sm:$0xff] %vm274_vm2, %v271_v19 }
  0xa1   : > { %v264_v21 = vpop.f32.mrf.mxu2  ;;  %v267_v22 = vpop.f32.mrf.mxu3 }
  0xa2   : > { %v265_v23 = vadd.f32 %v264_v21, %v217_v12  ;;  %v268_v24 = vadd.f32 %v267_v22, %v222_v20 }
  0xa4   : > { %v272_v25 = vmax.f32 %v265_v23, 0.0  ;;  %v273_v26 = vmax.f32 %v268_v24, 0.0 }
  0xa6   : > { %277 = vst.msk [vmem:[%s185_s9 + $0x10] sm:$0xff] %vm274_vm2, %v272_v25 }
  0xa7   : > { %278 = vst.msk [vmem:[%s185_s9 + $0x18] sm:$0xff] %vm274_vm2, %v273_v26 }
  0xa8   : > { %487 = shalt.err (!%p484_p5)
}
  0xa9   : > { %s541_s29 = smov 128   ;;  %s542_s30 = smov 8  }
  0xaa   : > { %400 = dma.vmem_to_hbm [thread:$0]  (%p603_p4), %s294_s10, 512, %s296_s11, %s280_s15, %s541_s29, %s541_s29, %s542_s30  }
  0xab PF: > { %p406_p6 = scmp.ge.s32.totalorder %s538_s17, 2  ;;  %s310_s4 = sand.u32 1, %s518_s12  }
  0xac   : > { %s311_s5 = scalar_lea.sflag [#allocation3], %s310_s4 }
  0xad   : > { %p403_p7 = pnand %p406_p6, %p610_p8 }
  0xaf   : > { %p404_p9 = pneg %p403_p7 }
  0xb1   : > { %513 = dma.done.wait (%p404_p9), %s311_s5, 512  }
  0xb2   : > { %515 = vsyncadd (%p404_p9), %s311_s5, 4294966784  ;;  %s16_s17 = sadd.s32 1, %s538_s17   ;;  %s694_s12 = smov %s522_s13 }
  0xb3   : > { %p13_p10 = scmp.ge.s32.totalorder %s16_s17, 4   ;;  %s695_s13 = smov %s526_s14 }
  0xb4   : > { %s696_s14 = smov %s616_s25  ;;  %s697_s15 = smov %s534_s16 }
  0xb5   : > { %s698_s16 = smov %s700_s20  ;;  %15 = sbr.rel (!%p13_p10) target bundleno = 4 (0x4), region = 67 }
  0xba   :  { %317 = vsyncpa [#allocation3], 1 }
  0xbb   :  { %319 = vsyncpa [#allocation3 + $0x1], 1 }

</bundles_post_ra>
